<compile_context>
chip_gen: v5e
topology: v5e:2x2
jax: 0.10.0
libtpu: 0.0.40
codegen_flags: <defaults>
</compile_context>

<pallas_src>
import jax
import jax.numpy as jnp
from jax import lax
from jax.experimental import pallas as pl
from jax.experimental.pallas import tpu as pltpu

IGNORE_LABEL = -1


def _bpd_kernel(sel_ref, pos_ref, logits_ref, out_ref, sum_acc):
    i = pl.program_id(1)                       # reduction axis (per TensorCore)

    @pl.when(i == 0)
    def _init():
        sum_acc[...] = jnp.zeros_like(sum_acc)

    pos = pos_ref[...]                                   # (R, P+1) bf16: [positions | 1]
    logits = logits_ref[...].astype(jnp.float32)         # (R, 128) lane-packed logits

    # rep[r, l] = pos[r, l // C] - l   (exact: bf16 operands hold ints in [-127, 127],
    # f32 accumulation).  One small MXU matmul; the MXU slot is otherwise idle.
    rep = jnp.dot(pos, sel_ref[...], preferred_element_type=jnp.float32)   # (R, 128)
    hot = rep == 0.0    # one-hot at each valid row's target lane; all-false if ignored

    # Select BEFORE squaring: rows past the end of `packed` (ragged tail / clamped
    # duplicate blocks) may hold garbage (NaN/Inf); hot is False there -> contribute 0.
    # Do NOT refactor to a mask-multiply form.
    d = jnp.where(hot, 1.0 - logits, 0.0)
    sum_acc[...] += jnp.sum(d * d, axis=0, keepdims=True)                  # (1, 128)

    @pl.when(i == pl.num_programs(1) - 1)
    def _fin():
        out_ref[0] = sum_acc[...]


def bpd_loss(boundary_logits, boundary_target, *, tile_rows=4096, num_cores=2):
    """boundary_logits: [N, C] float (any float dtype); boundary_target: [N] int."""
    N, C = boundary_logits.shape
    if 128 % C != 0:
        # TODO(synk): support class counts that do not divide 128 (pad the class axis).
        raise NotImplementedError("C must divide 128 for the lane-packed layout")
    P = 128 // C
    # Target lane positions are <= P*C - 1 = 127, so they are exact in bf16.
    assert P * C == 128

    G = -(-N // P)                                   # packed logits rows

    # Tile / grid geometry.  tr is 16-aligned (bf16 & f32 tile friendly) and divides
    # the padded pos row count exactly; the packed-logits tail block may be ragged.
    tr = max(16, (-(-min(int(tile_rows), G) // 16)) * 16)
    n_blocks = -(-G // tr)                           # real packed-logits blocks
    inner = -(-n_blocks // num_cores)                # row blocks per TensorCore
    total_rows = num_cores * inner * tr              # padded pos rows (covers whole grid)

    # Lane-dense packing of the logits (native dtype; free reshape when N % P == 0).
    if N % P == 0:
        packed = boundary_logits.reshape(G, 128)
    else:
        packed = jnp.pad(boundary_logits, ((0, G * P - N), (0, 0))).reshape(G, 128)

    # Per original row: target lane inside its packed row (-1 = ignore), plus a ones
    # column so the selector matmul can subtract the lane index.
    tgt = boundary_target.astype(jnp.int32)
    n_idx = jnp.arange(N, dtype=jnp.int32)
    pos = jnp.where(tgt != IGNORE_LABEL, (n_idx % P) * C + tgt, -1).astype(jnp.float32)
    pos = jnp.pad(pos, (0, total_rows * P - N), constant_values=-1.0)
    pos_aug = jnp.concatenate(
        [pos.reshape(total_rows, P), jnp.ones((total_rows, 1), jnp.float32)], axis=1
    ).astype(jnp.bfloat16)                                          # (total_rows, P+1)

    # Selector: sel[p, l] = 1 iff l // C == p ; extra last row = -l  =>  rep = pos - lane.
    sel_top = (lax.broadcasted_iota(jnp.int32, (P, 128), 1) // C
               == lax.broadcasted_iota(jnp.int32, (P, 128), 0)).astype(jnp.float32)
    sel = jnp.concatenate(
        [sel_top, -jnp.arange(128, dtype=jnp.float32)[None, :]], axis=0
    ).astype(jnp.bfloat16)                                          # (P+1, 128)

    # Valid-row count: tiny XLA reduce in the wrapper (overlaps with the kernel).
    count = jnp.sum((boundary_target != IGNORE_LABEL).astype(jnp.float32))

    last_blk = n_blocks - 1
    partial = pl.pallas_call(
        _bpd_kernel,
        out_shape=jax.ShapeDtypeStruct((num_cores, 1, 128), jnp.float32),
        grid_spec=pltpu.PrefetchScalarGridSpec(
            num_scalar_prefetch=0,
            grid=(num_cores, inner),
            in_specs=[
                # Tiny resident selector (same block every step -> fetched once).
                pl.BlockSpec((P + 1, 128), lambda c, i: (0, 0)),
                # Target positions (bf16), padded to cover the whole grid.
                pl.BlockSpec((tr, P + 1), lambda c, i: (c * inner + i, 0)),
                # Lane-packed logits, native dtype; clamp so the (rare) overflow block
                # on the last core re-reads a real block (its pos rows are all -1, so
                # it contributes exactly zero).
                pl.BlockSpec((tr, 128),
                             lambda c, i: (jnp.minimum(c * inner + i, last_blk), 0)),
            ],
            out_specs=pl.BlockSpec((1, 1, 128), lambda c, i: (c, 0, 0)),
            scratch_shapes=[pltpu.VMEM((1, 128), jnp.float32)],
        ),
        compiler_params=pltpu.CompilerParams(
            dimension_semantics=("parallel", "arbitrary")),
    )(sel, pos_aug, packed)

    # 0/0 = NaN when there are no valid targets, matching torch `.mean()` on empty.
    return jnp.sum(partial) / count


def bpd_loss_ref(boundary_logits, boundary_target):
    valid = boundary_target != IGNORE_LABEL
    safe_tgt = jnp.where(valid, boundary_target, 0).astype(jnp.int32)
    gathered = jnp.take_along_axis(
        boundary_logits.astype(jnp.float32), safe_tgt[:, None], axis=1)[:, 0]
    sq = (1.0 - gathered) ** 2
    return jnp.sum(jnp.where(valid, sq, 0.0)) / jnp.sum(valid.astype(jnp.float32))


if __name__ == "__main__":
    key = jax.random.PRNGKey(0)
    k1, k2, k3, k4 = jax.random.split(key, 4)

    # Flattened boundary pixels x boundary-class logits.
    N, C = 2048, 8
    boundary_logits = jax.random.normal(k1, (N, C), dtype=jnp.float32)
    boundary_target = jax.random.randint(k2, (N,), -1, C, dtype=jnp.int32)  # -1 = ignore

    loss = jax.block_until_ready(bpd_loss(boundary_logits, boundary_target))
    ref = jax.block_until_ready(bpd_loss_ref(boundary_logits, boundary_target))
    assert jnp.allclose(loss, ref, rtol=1e-5, atol=1e-6), (loss, ref)

    # Ragged case: N not divisible by the packing factor, multi-step inner grid per
    # core, ragged last logits block (exercises tail masking + accumulation).
    N2 = 1000
    logits2 = jax.random.normal(k3, (N2, C), dtype=jnp.float32)
    target2 = jax.random.randint(k4, (N2,), -1, C, dtype=jnp.int32)
    loss2 = jax.block_until_ready(bpd_loss(logits2, target2, tile_rows=16))
    ref2 = jax.block_until_ready(bpd_loss_ref(logits2, target2))
    assert jnp.allclose(loss2, ref2, rtol=1e-5, atol=1e-6), (loss2, ref2)

    # Native-bf16 logits stream through without any wrapper-side cast.
    lb16 = boundary_logits.astype(jnp.bfloat16)
    loss3 = jax.block_until_ready(bpd_loss(lb16, boundary_target))
    ref3 = jax.block_until_ready(bpd_loss_ref(lb16, boundary_target))
    assert jnp.allclose(loss3, ref3, rtol=1e-5, atol=1e-5), (loss3, ref3)

    print("KERNEL_OK")
</pallas_src>

<mosaic_0001>
module attributes {stable_mosaic.version = 11 : i64} {
  func.func @_bpd_kernel(%arg0: i32, %arg1: i32, %arg2: memref<17x128xbf16, #tpu.memory_space<vmem>>, %arg3: memref<128x17xbf16, #tpu.memory_space<vmem>>, %arg4: memref<128x128xf32, #tpu.memory_space<vmem>>, %arg5: memref<1x1x128xf32, #tpu.memory_space<vmem>>, %arg6: memref<1x128xf32, #tpu.memory_space<vmem>>) attributes {dimension_semantics = [#tpu.dimension_semantics<parallel>, #tpu.dimension_semantics<arbitrary>], iteration_bounds = array<i64: 2, 1>, scalar_prefetch = 0 : i64, scratch_operands = 1 : i64, tpu.core_type = #tpu.core_type<tc>, window_params = [{pipeline_mode = #tpu.pipeline_mode<synchronous>, transform_indices = @transform_0, window_bounds = array<i64: 17, 128>}, {transform_indices = @transform_1, window_bounds = array<i64: 128, 17>}, {transform_indices = @transform_2, window_bounds = array<i64: 128, 128>}, {transform_indices = @transform_3, window_bounds = array<i64: 1, 1, 128>}]} {
    %c0_i32 = arith.constant 0 : i32
    %0 = arith.cmpi eq, %arg1, %c0_i32 : i32
    %1 = arith.extui %0 : i1 to i32
    %c0_i32_0 = arith.constant 0 : i32
    %2 = arith.cmpi ne, %1, %c0_i32_0 : i32
    scf.if %2 {
      %cst_16 = arith.constant 0.000000e+00 : f32
      %22 = vector.broadcast %cst_16 : f32 to vector<1x128xf32>
      %c0_17 = arith.constant 0 : index
      %c0_18 = arith.constant 0 : index
      %23 = vector.load %arg6[%c0_17, %c0_18] : memref<1x128xf32, #tpu.memory_space<vmem>>, vector<1x128xf32>
      tpu.vector_store %arg6[%c0_17, %c0_18], %22 {strides = array<i32>} : memref<1x128xf32, #tpu.memory_space<vmem>>, vector<1x128xf32>,
    } else {
    }
    %c0 = arith.constant 0 : index
    %c0_1 = arith.constant 0 : index
    %3 = vector.load %arg3[%c0, %c0_1] : memref<128x17xbf16, #tpu.memory_space<vmem>>, vector<128x17xbf16>
    %c0_2 = arith.constant 0 : index
    %c0_3 = arith.constant 0 : index
    %4 = vector.load %arg4[%c0_2, %c0_3] : memref<128x128xf32, #tpu.memory_space<vmem>>, vector<128x128xf32>
    %c0_4 = arith.constant 0 : index
    %c0_5 = arith.constant 0 : index
    %5 = vector.load %arg2[%c0_4, %c0_5] : memref<17x128xbf16, #tpu.memory_space<vmem>>, vector<17x128xbf16>
    %cst = arith.constant dense<0.000000e+00> : vector<128x128xf32>
    %6 = tpu.matmul %3, %5, %cst {dimension_numbers = #tpu.dot_dimension_numbers<[1], [0], [0], [1], [0, 0, 1, 1], [], []>} : vector<128x17xbf16>, vector<17x128xbf16>, vector<128x128xf32> -> vector<128x128xf32>
    %cst_6 = arith.constant 0.000000e+00 : f32
    %7 = vector.broadcast %cst_6 : f32 to vector<128x128xf32>
    %8 = arith.cmpf oeq, %6, %7 : vector<128x128xf32>
    %cst_7 = arith.constant 1.000000e+00 : f32
    %9 = vector.broadcast %cst_7 : f32 to vector<128x128xf32>
    %10 = arith.subf %9, %4 : vector<128x128xf32>
    %cst_8 = arith.constant 0.000000e+00 : f32
    %11 = vector.broadcast %cst_8 : f32 to vector<128x128xf32>
    %12 = arith.select %8, %10, %11 : vector<128x128xi1>, vector<128x128xf32>
    %c0_9 = arith.constant 0 : index
    %c0_10 = arith.constant 0 : index
    %13 = vector.load %arg6[%c0_9, %c0_10] : memref<1x128xf32, #tpu.memory_space<vmem>>, vector<1x128xf32>
    %14 = arith.mulf %12, %12 : vector<128x128xf32>
    %cst_11 = arith.constant dense<0.000000e+00> : vector<128xf32>
    %15 = vector.multi_reduction <add>, %14, %cst_11 [0] : vector<128x128xf32> to vector<128xf32>
    %16 = vector.shape_cast %15 : vector<128xf32> to vector<1x128xf32>
    %17 = arith.addf %13, %16 : vector<1x128xf32>
    %c0_12 = arith.constant 0 : index
    %c0_13 = arith.constant 0 : index
    %18 = vector.load %arg6[%c0_12, %c0_13] : memref<1x128xf32, #tpu.memory_space<vmem>>, vector<1x128xf32>
    tpu.vector_store %arg6[%c0_12, %c0_13], %17 {strides = array<i32>} : memref<1x128xf32, #tpu.memory_space<vmem>>, vector<1x128xf32>,
    %c0_i32_14 = arith.constant 0 : i32
    %19 = arith.cmpi eq, %arg1, %c0_i32_14 : i32
    %20 = arith.extui %19 : i1 to i32
    %c0_i32_15 = arith.constant 0 : i32
    %21 = arith.cmpi ne, %20, %c0_i32_15 : i32
    scf.if %21 {
      %c0_16 = arith.constant 0 : index
      %c0_17 = arith.constant 0 : index
      %22 = vector.load %arg6[%c0_16, %c0_17] : memref<1x128xf32, #tpu.memory_space<vmem>>, vector<1x128xf32>
      %c0_18 = arith.constant 0 : index
      %c0_19 = arith.constant 0 : index
      %c0_20 = arith.constant 0 : index
      %23 = vector.load %arg5[%c0_18, %c0_19, %c0_20] : memref<1x1x128xf32, #tpu.memory_space<vmem>>, vector<1x1x128xf32>
      %24 = vector.shape_cast %23 : vector<1x1x128xf32> to vector<1x128xf32>
      %25 = vector.shape_cast %22 : vector<1x128xf32> to vector<1x1x128xf32>
      tpu.vector_store %arg5[%c0_18, %c0_19, %c0_20], %25 {strides = array<i32>} : memref<1x1x128xf32, #tpu.memory_space<vmem>>, vector<1x1x128xf32>,
    } else {
    }
    return
  }
  func.func @transform_0(%arg0: i32, %arg1: i32) -> (i32, i32) {
    %c0_i32 = arith.constant 0 : i32
    %c0_i32_0 = arith.constant 0 : i32
    %c0_i32_1 = arith.constant 0 : i32
    return %c0_i32, %c0_i32_0 : i32, i32
  }
  func.func @transform_1(%arg0: i32, %arg1: i32) -> (i32, i32) {
    %c1_i32 = arith.constant 1 : i32
    %0 = arith.muli %arg0, %c1_i32 : i32
    %1 = arith.addi %0, %arg1 : i32
    %c0_i32 = arith.constant 0 : i32
    %c0_i32_0 = arith.constant 0 : i32
    return %1, %c0_i32 : i32, i32
  }
  func.func @transform_2(%arg0: i32, %arg1: i32) -> (i32, i32) {
    %c1_i32 = arith.constant 1 : i32
    %0 = arith.muli %arg0, %c1_i32 : i32
    %1 = arith.addi %0, %arg1 : i32
    %c0_i32 = arith.constant 0 : i32
    %2 = arith.minsi %1, %c0_i32 : i32
    %c0_i32_0 = arith.constant 0 : i32
    %c0_i32_1 = arith.constant 0 : i32
    return %2, %c0_i32_0 : i32, i32
  }
  func.func @transform_3(%arg0: i32, %arg1: i32) -> (i32, i32, i32) {
    %c0_i32 = arith.constant 0 : i32
    %c0_i32_0 = arith.constant 0 : i32
    %c0_i32_1 = arith.constant 0 : i32
    return %arg0, %c0_i32, %c0_i32_0 : i32, i32, i32
  }
}

</mosaic_0001>

<bundles_post_ra>
// kernel: tpu_custom_call.1
= control target key start
LH: loop header
LB: loop body
LE: loop exit
PB: predicated region body
PF: predicated region fallthrough
CT: control target
= control target key end

     0   :  { %8 = vsyncpa [#allocation4], 0  ;;  %s957_s0 = inlined_call_operand.vmem [shape: bf16[17,128], index: 0, kind: input, shape index: {}]   ;;  %s958_s1 = inlined_call_operand.vmem [shape: bf16[256,17], index: 1, kind: input, shape index: {}]   ;;  %s959_s2 = inlined_call_operand.vmem [shape: f32[128,128], index: 2, kind: input, shape index: {}]   ;;  %s960_s3 = inlined_call_operand.hbm [shape: f32[2,1,128], index: 3, kind: output, shape index: {}]  }
   0x1   :  { %10 = vsyncpa [#allocation4 + $0x1], 0  ;;  %s812_s12 = smov 0   ;;  %s814_s13 = smov 0  }
   0x2   :  { %s816_s14 = smov 0   ;;  %s818_s15 = smov 0  }
   0x3   :  { %s820_s16 = smov 0   ;;  %s822_s17 = smov 0  }
   0x4 LB: > { %s583_s18 = sadd.s32 4294967295, %s788_s17   ;;  %s584_s19 = sadd.s32 4294967294, %s788_s17   ;;  %s788_s17 = sphi %s822_s17, %s16_s17   ;;  %s784_s16 = sphi %s820_s16, %s967_s16   ;;  %s780_s15 = sphi %s818_s15, %s966_s15   ;;  %s776_s14 = sphi %s816_s14, %s965_s14   ;;  %s772_s13 = sphi %s814_s13, %s964_s13   ;;  %s768_s12 = sphi %s812_s12, %s963_s12  }
   0x5   : > { %s28_s20 = sadd.s32 1, %s784_s16  ;;  %s116_s21 = sadd.s32 1, %s776_s14 }
   0x6   : > { %p30_p0 = scmp.ge.s32.totalorder %s28_s20, 2  ;;  %p126_p1 = scmp.ne.s32.totalorder %s776_s14, %s772_s13 }
   0x7   : > { %p127_p2 = scmp.eq.s32.totalorder %s583_s18, 1  ;;  %p132_p3 = scmp.ne.s32.totalorder %s772_s13, %s768_s12 }
   0x8   : > { %s969_s20 = smov (%p30_p0, %s28_s20), 0  ;;  %p133_p5 = scmp.eq.s32.totalorder %s584_s19, 1 }
   0x9   : > { %p852_p4 = por %p127_p2, %p126_p1  ;;  %s113_s23 = ssub.s32 %s784_s16, %s969_s20 }
   0xa   : > { %p587_p6 = scmp.ge.s32.totalorder %s788_s17, 1  ;;  %p114_p7 = scmp.eq.s32.totalorder %s113_s23, 0 }
   0xb   : > { %p859_p8 = por %p133_p5, %p132_p3  ;;  %p180_p9 = scmp.lt.s32.totalorder %s788_s17, 3 }
   0xc   : > { %s865_s25 = scalar_select %p114_p7, %s776_s14, %s116_s21  }
   0xd   : > { %p181_p10 = pnand %p587_p6, %p180_p9 }
   0xe   : > { %s588_s28 = sshll.u32 (!%p181_p10), %s780_s15, 4  ;;  %p221_p12 = scmp.lt.s32.totalorder (!%p181_p10), %s780_s15, 0 }
   0xf   : > { %184 = sbr.rel (%p181_p10) target bundleno = 239 (0xef), region = 32  ;;  %p214_p11 = scmp.lt.s32.totalorder (!%p181_p10), %s588_s28, 31 }
  0x10   : > { %s210_s21 = sand.u32 (!%p181_p10), 1, %s772_s13   ;;  %s504_s27 = scalar_lea.hbm (!%p181_p10), %s960_s3, %s780_s15 }
  0x11   : > { %s508_s30 = sshll.u32 (!%p181_p10), %s504_s27, 4  ;;  %s496_s4 = scalar_lea.sflag (!%p181_p10), [#allocation4], %s210_s21  ;;  %s509_s30 = int_to_ptr.hbm [resolvable:$true] %s508_s30 }
  0x12   : > { %s724_s5 = sshra.s32 (!%p181_p10), %s509_s30, 4  ;;  %s725_s5 = int_to_ptr.hbm [resolvable:$true] %s724_s5 }
  0x13   : > { %s726_s6 = scalar_lea.hbm (!%p181_p10), %s725_s5, 1  ;;  %p731_p3 = scmp.lt.s32.totalorder (!%p181_p10), %s725_s5, %s960_s3 }
  0x14   : > { %v272_v0 = vld [vmem:[%s957_s0 + $0x8] sm:$0x1]  ;;  %vm347_vm0 = vcmask 1040384   ;;  %v790_v2 = vmov 0   ;;  %s971_s28 = smov (!%p214_p11, %s588_s28), 31  ;;  %v646_v6 = vld [vmem:[%s957_s0] sm:$0xff]  ;;  %p727_p0 = scmp.ne.s32.totalorder %s725_s5, %s726_s6 }
  0x15   : > { %v318_v1 = vunpack.c.l.b16 %v272_v0  ;;  %v349_v3 = vsel %vm347_vm0, 65535, %v790_v2  ;;  %s589_s29 = sshll.u32 %s971_s28, 2  ;;  %vm322_vm1 = vcmask 138240   ;;  %v791_v35 = vmov 0.0   ;;  %s211_s28 = scalar_lea.vmem [#allocation3], %s210_s21 }
  0x16   : > { %s217_s7 = scalar_lea.vmem %s958_s1, %s589_s29  ;;  %237 = vst [vmem:[#allocation2] sm:$0x1] %v791_v35  ;;  %s506_s29 = sshll.u32 %s211_s28, 4  ;;  %s507_s29 = int_to_ptr.vmem [resolvable:$true] %s506_s29 }
  0x17   : > { %v320_v4 = vpack.c.b16 %v318_v1, %v318_v1  ;;  %v638_v7 = vld [vmem:[%s217_s7] sm:$0xff]  ;;  %v640_v8 = vld [vmem:[%s217_s7 + $0x10] sm:$0xff]  ;;  %v639_v11 = vld [vmem:[%s217_s7 + $0x8] sm:$0xff]  ;;  %s222_s8 = scalar_select %p221_p12, %s780_s15, 0 }
  0x18   : > { %v642_v9 = vld [vmem:[%s217_s7 + $0x20] sm:$0xff]  ;;  %v644_v10 = vld [vmem:[%s217_s7 + $0x30] sm:$0xff]  ;;  %v641_v12 = vld [vmem:[%s217_s7 + $0x18] sm:$0xff]  ;;  %p728_p1 = pnand %p727_p0, %p852_p4 }
  0x19   : > { %v351_v5 = vand.u32 %v349_v3, %v320_v4  ;;  %v643_v13 = vld [vmem:[%s217_s7 + $0x28] sm:$0xff]  ;;  %v645_v14 = vld [vmem:[%s217_s7 + $0x38] sm:$0xff]  ;;  %s590_s9 = sshll.u32 %s222_s8, 4 }
  0x1a   : > { %p224_p13 = scmp.lt.s32.totalorder %s590_s9, 15  ;;  %p729_p2 = pneg %p728_p1 }
  0x1b   : > { %359 = vmatpush.bf16.msra.mxu0 %v351_v5  ;;  %647 = vmatpush.bf16.msra.mxu1 %v351_v5 }
  0x1c   : > { %648 = vmatpush.bf16.msra.mxu2 %v351_v5  ;;  %649 = vmatpush.bf16.msra.mxu3 %v351_v5  ;;  %s973_s9 = smov (!%p224_p13, %s590_s9), 15 }
  0x1d   : > { %s591_s10 = sshll.u32 %s973_s9, 3  ;;  %s730_s9 = scalar_lea.hbm %s960_s3, 2 }
  0x1e   : > { %s892_s19 = scalar_lea.vmem %s959_s2, %s591_s10  ;;  %p732_p5 = scmp.lt.s32.totalorder %s730_s9, %s726_s6 }
  0x1f   : > { %360 = vmatpush.bf16.msra.mxu0 %v646_v6  ;;  %650 = vmatpush.bf16.msra.mxu1 %v646_v6  ;;  %v255_v20 = vld [vmem:[%s892_s19 + $0x8] sm:$0xff]  ;;  %v254_v22 = vld [vmem:[%s892_s19] sm:$0xff]  ;;  %v256_v23 = vld [vmem:[%s892_s19 + $0x10] sm:$0xff] }
  0x20   : > { %651 = vmatpush.bf16.msra.mxu2 %v646_v6  ;;  %652 = vmatpush.bf16.msra.mxu3 %v646_v6  ;;  %v419_v24 = vsub.f32 1.0, %v255_v20  ;;  %v418_v26 = vsub.f32 1.0, %v254_v22  ;;  %v420_v28 = vsub.f32 1.0, %v256_v23  ;;  %v258_v31 = vld [vmem:[%s892_s19 + $0x20] sm:$0xff]  ;;  %v257_v32 = vld [vmem:[%s892_s19 + $0x18] sm:$0xff]  ;;  %v259_v37 = vld [vmem:[%s892_s19 + $0x28] sm:$0xff]  ;;  %p733_p6 = por %p732_p5, %p731_p3 }
  0x21   : > { %v422_v38 = vsub.f32 1.0, %v258_v31  ;;  %v421_v39 = vsub.f32 1.0, %v257_v32  ;;  %v260_v43 = vld [vmem:[%s892_s19 + $0x30] sm:$0xff]  ;;  %v423_v44 = vsub.f32 1.0, %v259_v37  ;;  %v261_v48 = vld [vmem:[%s892_s19 + $0x38] sm:$0xff]  ;;  %v262_v53 = vld [vmem:[%s892_s19 + $0x40] sm:$0xff] }
  0x22   : > { %628 = vmatmul.msk.bf16.vlgmr.msra.gmra.mxu0 %vm322_vm1, %v638_v7  ;;  %630 = vmatmul.msk.bf16.vlgmr.msra.gmra.mxu1 %vm322_vm1, %v640_v8  ;;  %v424_v50 = vsub.f32 1.0, %v260_v43  ;;  %v425_v57 = vsub.f32 1.0, %v261_v48  ;;  %v263_v59 = vld [vmem:[%s892_s19 + $0x48] sm:$0xff]  ;;  %v426_v61 = vsub.f32 1.0, %v262_v53  ;;  %v264_v1 = vld [vmem:[%s892_s19 + $0x50] sm:$0xff]  ;;  %v265_v7 = vld [vmem:[%s892_s19 + $0x58] sm:$0xff]  ;;  %p734_p7 = pnand %p733_p6, %p729_p2 }
  0x23   : > { %632 = vmatmul.msk.bf16.vlgmr.msra.gmra.mxu2 %vm322_vm1, %v642_v9  ;;  %634 = vmatmul.msk.bf16.vlgmr.msra.gmra.mxu3 %vm322_vm1, %v644_v10  ;;  %v427_v2 = vsub.f32 1.0, %v263_v59  ;;  %v428_v9 = vsub.f32 1.0, %v264_v1 }
  0x32   : > { %629 = vmatmul.msk.bf16.gmra.mxu0 %vm322_vm1, %v639_v11  ;;  %631 = vmatmul.msk.bf16.gmra.mxu1 %vm322_vm1, %v641_v12  ;;  %v266_v11 = vld [vmem:[%s892_s19 + $0x60] sm:$0xff] }
  0x33   : > { %633 = vmatmul.msk.bf16.gmra.mxu2 %vm322_vm1, %v643_v13  ;;  %635 = vmatmul.msk.bf16.gmra.mxu3 %vm322_vm1, %v645_v14 }
  0x9f   : > { %v362_v15 = vpop.f32.mrf.mxu0  ;;  %v372_v16 = vpop.f32.mrf.mxu1 }
  0xa0   : > { %vm402_vm3 = vcmp.eq.f32.partialorder %v362_v15, 0.0  ;;  %vm406_vm5 = vcmp.eq.f32.partialorder %v372_v16, 0.0  ;;  %v429_v15 = vsub.f32 1.0, %v265_v7 }
  0xa1   : > { %v434_v33 = vsel %vm402_vm3, %v418_v26, 0.0  ;;  %v438_v49 = vsel %vm406_vm5, %v422_v38, 0.0 }
  0xa2   : > { %v451_v41 = vmul.f32 %v434_v33, %v434_v33  ;;  %v455_v58 = vmul.f32 %v438_v49, %v438_v49 }
  0xa6   : > { %v887_v17 = vpop.f32.mrf.mxu2  ;;  %v895_v21 = vpop.f32.mrf.mxu3 }
  0xa7   : > { %v364_v18 = vpop.f32.mrf.mxu0  ;;  %v374_v19 = vpop.f32.mrf.mxu1  ;;  %vm410_vm10 = vcmp.eq.f32.partialorder %v887_v17, 0.0  ;;  %vm414_vm14 = vcmp.eq.f32.partialorder %v895_v21, 0.0 }
  0xa8   : > { %vm403_vm2 = vcmp.eq.f32.partialorder %v364_v18, 0.0  ;;  %vm407_vm6 = vcmp.eq.f32.partialorder %v374_v19, 0.0  ;;  %v442_v8 = vsel %vm410_vm10, %v426_v61, 0.0  ;;  %v267_v18 = vld [vmem:[%s892_s19 + $0x68] sm:$0xff]  ;;  %v430_v19 = vsub.f32 1.0, %v266_v11 }
  0xa9   : > { %v435_v30 = vsel %vm403_vm2, %v419_v24, 0.0  ;;  %v439_v56 = vsel %vm407_vm6, %v423_v44, 0.0  ;;  %v459_v16 = vmul.f32 %v442_v8, %v442_v8  ;;  %v268_v24 = vld [vmem:[%s892_s19 + $0x70] sm:$0xff] }
  0xaa   : > { %v452_v36 = vmul.f32 %v435_v30, %v435_v30  ;;  %v456_v63 = vmul.f32 %v439_v56, %v439_v56  ;;  %v446_v30 = vsel %vm414_vm14, %v430_v19, 0.0  ;;  %v432_v31 = vsub.f32 1.0, %v268_v24 }
  0xab   : > { %v463_v37 = vmul.f32 %v446_v30, %v446_v30 }
  0xac   : > { %v467_v47 = vadd.f32 %v452_v36, %v451_v41 }
  0xae   : > { %v899_v25 = vpop.f32.mrf.mxu2  ;;  %v904_v40 = vpop.f32.mrf.mxu3 }
  0xaf   : > { %v367_v27 = vpop.f32.mrf.mxu0  ;;  %v377_v29 = vpop.f32.mrf.mxu1  ;;  %vm411_vm11 = vcmp.eq.f32.partialorder %v899_v25, 0.0  ;;  %v431_v25 = vsub.f32 1.0, %v267_v18  ;;  %vm415_vm15 = vcmp.eq.f32.partialorder %v904_v40, 0.0 }
  0xb0   : > { %vm404_vm4 = vcmp.eq.f32.partialorder %v367_v27, 0.0  ;;  %vm408_vm8 = vcmp.eq.f32.partialorder %v377_v29, 0.0  ;;  %v443_v14 = vsel %vm411_vm11, %v427_v2, 0.0  ;;  %v269_v29 = vld [vmem:[%s892_s19 + $0x78] sm:$0xff] }
  0xb1   : > { %v436_v34 = vsel %vm404_vm4, %v420_v28, 0.0  ;;  %v440_v62 = vsel %vm408_vm8, %v424_v50, 0.0  ;;  %v460_v22 = vmul.f32 %v443_v14, %v443_v14  ;;  %v447_v35 = vsel %vm415_vm15, %v431_v25, 0.0 }
  0xb2   : > { %v453_v42 = vmul.f32 %v436_v34, %v436_v34  ;;  %v457_v5 = vmul.f32 %v440_v62, %v440_v62  ;;  %v433_v36 = vsub.f32 1.0, %v269_v29 }
  0xb4   : > { %v468_v54 = vadd.f32 %v467_v47, %v453_v42 }
  0xb6   : > { %v387_v46 = vpop.f32.mrf.mxu2  ;;  %v397_v4 = vpop.f32.mrf.mxu3 }
  0xb7   : > { %v369_v45 = vpop.f32.mrf.mxu0  ;;  %v379_v52 = vpop.f32.mrf.mxu1  ;;  %vm412_vm12 = vcmp.eq.f32.partialorder %v387_v46, 0.0  ;;  %vm416_vm0 = vcmp.eq.f32.partialorder %v397_v4, 0.0 }
  0xb8   : > { %vm405_vm7 = vcmp.eq.f32.partialorder %v369_v45, 0.0  ;;  %vm409_vm9 = vcmp.eq.f32.partialorder %v379_v52, 0.0  ;;  %v444_v20 = vsel %vm412_vm12, %v428_v9, 0.0  ;;  %v448_v21 = vsel %vm416_vm0, %v432_v31, 0.0  ;;  %v450_v52 = vld [vmem:[#allocation2] sm:$0x1] }
  0xb9   : > { %v437_v51 = vsel %vm405_vm7, %v421_v39, 0.0  ;;  %v441_v3 = vsel %vm409_vm9, %v425_v57, 0.0  ;;  %v461_v27 = vmul.f32 %v444_v20, %v444_v20  ;;  %v464_v39 = vmul.f32 %v447_v35, %v447_v35 }
  0xba   : > { %v454_v55 = vmul.f32 %v437_v51, %v437_v51  ;;  %v458_v12 = vmul.f32 %v441_v3, %v441_v3  ;;  %v465_v43 = vmul.f32 %v448_v21, %v448_v21 }
  0xbc   : > { %v469_v60 = vadd.f32 %v468_v54, %v454_v55 }
  0xbe   : > { %v470_v0 = vadd.f32 %v469_v60, %v455_v58  ;;  %v389_v10 = vpop.f32.mrf.mxu2  ;;  %v399_v32 = vpop.f32.mrf.mxu3 }
  0xbf   : > { %vm413_vm13 = vcmp.eq.f32.partialorder %v389_v10, 0.0  ;;  %vm417_vm1 = vcmp.eq.f32.partialorder %v399_v32, 0.0 }
  0xc0   : > { %v471_v6 = vadd.f32 %v470_v0, %v456_v63  ;;  %v445_v26 = vsel %vm413_vm13, %v429_v15, 0.0  ;;  %v449_v42 = vsel %vm417_vm1, %v433_v36, 0.0 }
  0xc1   : > { %v462_v34 = vmul.f32 %v445_v26, %v445_v26  ;;  %v466_v45 = vmul.f32 %v449_v42, %v449_v42 }
  0xc2   : > { %v472_v13 = vadd.f32 %v471_v6, %v457_v5 }
  0xc4   : > { %v473_v17 = vadd.f32 %v472_v13, %v458_v12 }
  0xc6   : > { %v474_v23 = vadd.f32 %v473_v17, %v459_v16 }
  0xc8   : > { %v475_v28 = vadd.f32 %v474_v23, %v460_v22 }
  0xca   : > { %v476_v33 = vadd.f32 %v475_v28, %v461_v27 }
  0xcc   : > { %v477_v38 = vadd.f32 %v476_v33, %v462_v34 }
  0xce   : > { %v478_v41 = vadd.f32 %v477_v38, %v463_v37 }
  0xd0   : > { %v479_v40 = vadd.f32 %v478_v41, %v464_v39 }
  0xd2   : > { %v480_v44 = vadd.f32 %v479_v40, %v465_v43 }
  0xd4   : > { %v481_v46 = vadd.f32 %v480_v44, %v466_v45 }
  0xd6   : > { %v482_v47 = vrot.slane %v481_v46, 4 }
  0xd8   : > { %v483_v48 = vadd.f32 %v482_v47, %v481_v46 }
  0xda   : > { %v484_v49 = vrot.slane %v483_v48, 2 }
  0xdc   : > { %v485_v50 = vadd.f32 %v484_v49, %v483_v48 }
  0xde   : > { %v486_v51 = vrot.slane %v485_v50, 1 }
  0xe0   : > { %v487_v53 = vadd.f32 %v486_v51, %v485_v50 }
  0xe2   : > { %v488_v54 = vadd.f32 %v487_v53, %v450_v52 }
  0xe4   : > { %489 = vst [vmem:[#allocation2] sm:$0x1] %v488_v54 }
  0xeb   : > { %v493_v55 = vld [vmem:[#allocation2] sm:$0x1] }
  0xec   : > { %494 = vst [vmem:[%s211_s28] sm:$0x1] %v493_v55 }
  0xed   : > { %737 = shalt.err (!%p734_p7)
}
  0xee   : > { %653 = dma.vmem_to_hbm [thread:$0]  (%p852_p4), %s507_s29, 16, %s509_s30, %s496_s4  }
  0xef PF: > { %p659_p9 = scmp.ge.s32.totalorder %s788_s17, 2  ;;  %s520_s11 = sand.u32 1, %s768_s12  }
  0xf0   : > { %s521_s18 = scalar_lea.sflag [#allocation4], %s520_s11 }
  0xf1   : > { %p656_p10 = pnand %p659_p9, %p859_p8 }
  0xf3   : > { %p657_p11 = pneg %p656_p10 }
  0xf5   : > { %763 = dma.done.wait (%p657_p11), %s521_s18, 16  }
  0xf6   : > { %765 = vsyncadd (%p657_p11), %s521_s18, 4294967280  ;;  %s16_s17 = sadd.s32 1, %s788_s17   ;;  %s963_s12 = smov %s772_s13 }
  0xf7   : > { %p13_p12 = scmp.ge.s32.totalorder %s16_s17, 4   ;;  %s964_s13 = smov %s776_s14 }
  0xf8   : > { %s965_s14 = smov %s865_s25  ;;  %s966_s15 = smov %s784_s16 }
  0xf9   : > { %s967_s16 = smov %s969_s20  ;;  %15 = sbr.rel (!%p13_p12) target bundleno = 4 (0x4), region = 78 }
  0xfe   :  { %526 = vsyncpa [#allocation4], 1 }
  0xff   :  { %528 = vsyncpa [#allocation4 + $0x1], 1 }

</bundles_post_ra>
